<compile_context>
chip_gen: v5e
topology: v5e:2x2
jax: 0.10.0
libtpu: 0.0.40
codegen_flags: <defaults>
</compile_context>

<pallas_src>
import functools

import jax
import jax.numpy as jnp
from jax.experimental import pallas as pl
from jax.experimental.pallas import tpu as pltpu


def _round_up(x, m):
    return ((x + m - 1) // m) * m


def _chamfer_kernel(x1_ref, x2t_ref, d1_ref, d2_ref, *, n, m, n_pad, m_pad, tn):
    i = pl.program_id(1)  # inner N-tile index (reduction axis for dist2)

    # dist2 running-min accumulator lives in the resident output block.
    @pl.when(i == 0)
    def _():
        d2_ref[...] = jnp.full(d2_ref.shape, jnp.inf, dtype=d2_ref.dtype)

    x1 = x1_ref[0]    # (tn, D)      D = 3
    x2t = x2t_ref[0]  # (D, M_pad)   lane-dense

    # Squared-norm terms on the VPU, cross term on the MXU.
    n1 = jnp.sum(x1 * x1, axis=1, keepdims=True)                    # (tn, 1)
    n2 = jnp.sum(x2t * x2t, axis=0, keepdims=True)                  # (1, M_pad)
    cross = jnp.dot(x1, x2t, preferred_element_type=jnp.float32)    # (tn, M_pad)
    dist = jnp.maximum(n1 + n2 - 2.0 * cross, 0.0)                  # (tn, M_pad)

    # Mask padded x2 columns out of the dist1 min (static: only if padded).
    if m_pad != m:
        col = jax.lax.broadcasted_iota(jnp.int32, dist.shape, 1)
        dist_d1 = jnp.where(col < m, dist, jnp.inf)
    else:
        dist_d1 = dist

    # Mask padded x1 rows out of the dist2 min (static: only if padded).
    if n_pad != n:
        row = jax.lax.broadcasted_iota(jnp.int32, dist.shape, 0) + i * tn
        dist_d2 = jnp.where(row < n, dist, jnp.inf)
    else:
        dist_d2 = dist

    d1_ref[...] = jnp.min(dist_d1, axis=1).reshape(1, 1, tn)
    d2_ref[...] = jnp.minimum(
        d2_ref[...], jnp.min(dist_d2, axis=0).reshape(1, 1, m_pad)
    )


def chamfer_distance(xyz1, xyz2, *, block_n=256):
    """Pallas TPU Chamfer distance forward. Returns (dist1, dist2)."""
    B, N, D = xyz1.shape
    B2, M, D2 = xyz2.shape
    assert B == B2 and D == D2

    xyz1 = xyz1.astype(jnp.float32)
    xyz2 = xyz2.astype(jnp.float32)

    # Lane-dense tiling: N-tile and M padded to multiples of 128.
    tn = _round_up(min(block_n, _round_up(N, 128)), 128)
    n_pad = _round_up(N, tn)
    m_pad = _round_up(M, 128)
    num_n_tiles = n_pad // tn

    x1p = xyz1
    if n_pad != N:
        x1p = jnp.pad(xyz1, ((0, 0), (0, n_pad - N), (0, 0)))
    x2t = jnp.transpose(xyz2, (0, 2, 1))  # (B, D, M): point index on lanes
    if m_pad != M:
        x2t = jnp.pad(x2t, ((0, 0), (0, 0), (0, m_pad - M)))

    kernel = functools.partial(
        _chamfer_kernel, n=N, m=M, n_pad=n_pad, m_pad=m_pad, tn=tn
    )

    # Rough VMEM budget: dist tile (+ temporaries), double-buffered inputs,
    # resident outputs.  Capped below the v7x 64 MiB physical VMEM.
    vmem_bytes = (
        4 * tn * m_pad * 4        # dist tile + elementwise temporaries
        + 2 * 8 * m_pad * 4       # x2t (sublane-padded), double-buffered
        + 2 * tn * 128 * 4        # x1 tile (lane-padded), double-buffered
        + 2 * 8 * (m_pad + tn) * 4  # outputs
    )
    vmem_limit = int(min(max(vmem_bytes, 32 * 1024 * 1024), 56 * 1024 * 1024))

    d1, d2 = pl.pallas_call(
        kernel,
        out_shape=(
            jax.ShapeDtypeStruct((B, 1, n_pad), jnp.float32),
            jax.ShapeDtypeStruct((B, 1, m_pad), jnp.float32),
        ),
        grid_spec=pltpu.PrefetchScalarGridSpec(
            num_scalar_prefetch=0,
            grid=(B, num_n_tiles),
            in_specs=[
                pl.BlockSpec((1, tn, D), lambda b, i: (b, i, 0)),
                # constant over the inner axis -> x2 stays VMEM-resident
                pl.BlockSpec((1, D, m_pad), lambda b, i: (b, 0, 0)),
            ],
            out_specs=[
                pl.BlockSpec((1, 1, tn), lambda b, i: (b, 0, i)),
                # revisited across the inner axis -> running-min accumulator
                pl.BlockSpec((1, 1, m_pad), lambda b, i: (b, 0, 0)),
            ],
        ),
        compiler_params=pltpu.CompilerParams(
            dimension_semantics=("parallel", "arbitrary"),
            vmem_limit_bytes=vmem_limit,
        ),
    )(x1p, x2t)

    return d1[:, 0, :N], d2[:, 0, :M]


def _chamfer_reference(xyz1, xyz2):
    # plain-JAX reference (exact (a-b)^2 form) for correctness checking
    diff = xyz1[:, :, None, :] - xyz2[:, None, :, :]        # (B, N, M, 3)
    d = jnp.sum(diff * diff, axis=-1)                        # (B, N, M)
    return jnp.min(d, axis=2), jnp.min(d, axis=1)            # (B, N), (B, M)


# TODO(synk): backward pass (and the idx1/idx2 argmin indices it needs) is not
# implemented; this kernel covers ChamferDistanceFunction.forward only.


if __name__ == "__main__":
    key = jax.random.PRNGKey(0)

    def _check(B, N, M):
        k1, k2 = jax.random.split(jax.random.fold_in(key, N * 1000 + M))
        xyz1 = jax.random.normal(k1, (B, N, 3), dtype=jnp.float32)
        xyz2 = jax.random.normal(k2, (B, M, 3), dtype=jnp.float32)

        d1, d2 = jax.jit(chamfer_distance)(xyz1, xyz2)
        jax.block_until_ready((d1, d2))

        r1, r2 = _chamfer_reference(xyz1, xyz2)
        assert d1.shape == (B, N) and d2.shape == (B, M)
        assert d1.dtype == jnp.float32 and d2.dtype == jnp.float32
        assert jnp.allclose(d1, r1, rtol=1e-4, atol=1e-4), float(
            jnp.max(jnp.abs(d1 - r1))
        )
        assert jnp.allclose(d2, r2, rtol=1e-4, atol=1e-4), float(
            jnp.max(jnp.abs(d2 - r2))
        )

    # small clouds (padded / masked path, matches the module's typical use)
    _check(2, 64, 80)
    # multiple N-tiles, no padding (exercises the resident dist2 accumulator)
    _check(2, 512, 256)

    print("KERNEL_OK")
</pallas_src>

<mosaic_0001>
module attributes {stable_mosaic.version = 11 : i64} {
  func.func @_chamfer_kernel(%arg0: i32, %arg1: i32, %arg2: memref<1x128x3xf32, #tpu.memory_space<vmem>>, %arg3: memref<1x3x128xf32, #tpu.memory_space<vmem>>, %arg4: memref<1x1x128xf32, #tpu.memory_space<vmem>>, %arg5: memref<1x1x128xf32, #tpu.memory_space<vmem>>) attributes {dimension_semantics = [#tpu.dimension_semantics<parallel>, #tpu.dimension_semantics<arbitrary>], iteration_bounds = array<i64: 2, 1>, scalar_prefetch = 0 : i64, scratch_operands = 0 : i64, tpu.core_type = #tpu.core_type<tc>, window_params = [{transform_indices = @transform_0, window_bounds = array<i64: 1, 128, 3>}, {transform_indices = @transform_1, window_bounds = array<i64: 1, 3, 128>}, {transform_indices = @transform_2, window_bounds = array<i64: 1, 1, 128>}, {transform_indices = @transform_3, window_bounds = array<i64: 1, 1, 128>}]} {
    %c0_i32 = arith.constant 0 : i32
    %0 = arith.cmpi eq, %arg1, %c0_i32 : i32
    %1 = arith.extui %0 : i1 to i32
    %c0_i32_0 = arith.constant 0 : i32
    %2 = arith.cmpi ne, %1, %c0_i32_0 : i32
    scf.if %2 {
      %cst_23 = arith.constant 0x7F800000 : f32
      %43 = vector.broadcast %cst_23 : f32 to vector<1x1x128xf32>
      %c0_24 = arith.constant 0 : index
      %c0_25 = arith.constant 0 : index
      %c0_26 = arith.constant 0 : index
      %44 = vector.load %arg5[%c0_24, %c0_25, %c0_26] : memref<1x1x128xf32, #tpu.memory_space<vmem>>, vector<1x1x128xf32>
      tpu.vector_store %arg5[%c0_24, %c0_25, %c0_26], %43 {strides = array<i32>} : memref<1x1x128xf32, #tpu.memory_space<vmem>>, vector<1x1x128xf32>,
    } else {
    }
    %c0 = arith.constant 0 : index
    %c0_1 = arith.constant 0 : index
    %c0_2 = arith.constant 0 : index
    %3 = vector.load %arg2[%c0, %c0_1, %c0_2] : memref<1x128x3xf32, #tpu.memory_space<vmem>>, vector<1x128x3xf32>
    %4 = vector.shape_cast %3 : vector<1x128x3xf32> to vector<128x3xf32>
    %c0_3 = arith.constant 0 : index
    %c0_4 = arith.constant 0 : index
    %c0_5 = arith.constant 0 : index
    %5 = vector.load %arg3[%c0_3, %c0_4, %c0_5] : memref<1x3x128xf32, #tpu.memory_space<vmem>>, vector<1x3x128xf32>
    %6 = vector.shape_cast %5 : vector<1x3x128xf32> to vector<3x128xf32>
    %7 = arith.mulf %4, %4 : vector<128x3xf32>
    %cst = arith.constant dense<0.000000e+00> : vector<128xf32>
    %8 = vector.multi_reduction <add>, %7, %cst [1] : vector<128x3xf32> to vector<128xf32>
    %9 = vector.shape_cast %8 : vector<128xf32> to vector<128x1xf32>
    %10 = arith.mulf %6, %6 : vector<3x128xf32>
    %cst_6 = arith.constant dense<0.000000e+00> : vector<128xf32>
    %11 = vector.multi_reduction <add>, %10, %cst_6 [0] : vector<3x128xf32> to vector<128xf32>
    %12 = vector.shape_cast %11 : vector<128xf32> to vector<1x128xf32>
    %cst_7 = arith.constant dense<0.000000e+00> : vector<128x128xf32>
    %13 = tpu.matmul %4, %6, %cst_7 {dimension_numbers = #tpu.dot_dimension_numbers<[1], [0], [0], [1], [0, 0, 1, 1], [], []>} : vector<128x3xf32>, vector<3x128xf32>, vector<128x128xf32> -> vector<128x128xf32>
    %14 = vector.broadcast %9 : vector<128x1xf32> to vector<128x128xf32>
    %15 = vector.broadcast %12 : vector<1x128xf32> to vector<128x128xf32>
    %16 = arith.addf %14, %15 : vector<128x128xf32>
    %cst_8 = arith.constant 2.000000e+00 : f32
    %17 = vector.broadcast %cst_8 : f32 to vector<128x128xf32>
    %18 = arith.mulf %17, %13 : vector<128x128xf32>
    %19 = arith.subf %16, %18 : vector<128x128xf32>
    %cst_9 = arith.constant 0.000000e+00 : f32
    %20 = vector.broadcast %cst_9 : f32 to vector<128x128xf32>
    %21 = arith.maximumf %19, %20 : vector<128x128xf32>
    %22 = tpu.iota {dimensions = array<i32: 1>} : vector<128x128xi32>
    %c80_i32 = arith.constant 80 : i32
    %23 = vector.broadcast %c80_i32 : i32 to vector<128x128xi32>
    %24 = arith.cmpi slt, %22, %23 : vector<128x128xi32>
    %cst_10 = arith.constant 0x7F800000 : f32
    %25 = vector.broadcast %cst_10 : f32 to vector<128x128xf32>
    %26 = arith.select %24, %21, %25 : vector<128x128xi1>, vector<128x128xf32>
    %27 = tpu.iota {dimensions = array<i32: 0>} : vector<128x128xi32>
    %c128_i32 = arith.constant 128 : i32
    %28 = arith.muli %arg1, %c128_i32 : i32
    %29 = vector.broadcast %28 : i32 to vector<128x128xi32>
    %30 = arith.addi %27, %29 : vector<128x128xi32>
    %c64_i32 = arith.constant 64 : i32
    %31 = vector.broadcast %c64_i32 : i32 to vector<128x128xi32>
    %32 = arith.cmpi slt, %30, %31 : vector<128x128xi32>
    %cst_11 = arith.constant 0x7F800000 : f32
    %33 = vector.broadcast %cst_11 : f32 to vector<128x128xf32>
    %34 = arith.select %32, %21, %33 : vector<128x128xi1>, vector<128x128xf32>
    %cst_12 = arith.constant dense<0x7F800000> : vector<128xf32>
    %35 = vector.multi_reduction <minimumf>, %26, %cst_12 [1] : vector<128x128xf32> to vector<128xf32>
    %36 = vector.shape_cast %35 : vector<128xf32> to vector<1x1x128xf32>
    %c0_13 = arith.constant 0 : index
    %c0_14 = arith.constant 0 : index
    %c0_15 = arith.constant 0 : index
    %37 = vector.load %arg4[%c0_13, %c0_14, %c0_15] : memref<1x1x128xf32, #tpu.memory_space<vmem>>, vector<1x1x128xf32>
    tpu.vector_store %arg4[%c0_13, %c0_14, %c0_15], %36 {strides = array<i32>} : memref<1x1x128xf32, #tpu.memory_space<vmem>>, vector<1x1x128xf32>,
    %c0_16 = arith.constant 0 : index
    %c0_17 = arith.constant 0 : index
    %c0_18 = arith.constant 0 : index
    %38 = vector.load %arg5[%c0_16, %c0_17, %c0_18] : memref<1x1x128xf32, #tpu.memory_space<vmem>>, vector<1x1x128xf32>
    %cst_19 = arith.constant dense<0x7F800000> : vector<128xf32>
    %39 = vector.multi_reduction <minimumf>, %34, %cst_19 [0] : vector<128x128xf32> to vector<128xf32>
    %40 = vector.shape_cast %39 : vector<128xf32> to vector<1x1x128xf32>
    %41 = arith.minimumf %38, %40 : vector<1x1x128xf32>
    %c0_20 = arith.constant 0 : index
    %c0_21 = arith.constant 0 : index
    %c0_22 = arith.constant 0 : index
    %42 = vector.load %arg5[%c0_20, %c0_21, %c0_22] : memref<1x1x128xf32, #tpu.memory_space<vmem>>, vector<1x1x128xf32>
    tpu.vector_store %arg5[%c0_20, %c0_21, %c0_22], %41 {strides = array<i32>} : memref<1x1x128xf32, #tpu.memory_space<vmem>>, vector<1x1x128xf32>,
    return
  }
  func.func @transform_0(%arg0: i32, %arg1: i32) -> (i32, i32, i32) {
    %c0_i32 = arith.constant 0 : i32
    %c0_i32_0 = arith.constant 0 : i32
    return %arg0, %arg1, %c0_i32 : i32, i32, i32
  }
  func.func @transform_1(%arg0: i32, %arg1: i32) -> (i32, i32, i32) {
    %c0_i32 = arith.constant 0 : i32
    %c0_i32_0 = arith.constant 0 : i32
    %c0_i32_1 = arith.constant 0 : i32
    return %arg0, %c0_i32, %c0_i32_0 : i32, i32, i32
  }
  func.func @transform_2(%arg0: i32, %arg1: i32) -> (i32, i32, i32) {
    %c0_i32 = arith.constant 0 : i32
    %c0_i32_0 = arith.constant 0 : i32
    return %arg0, %c0_i32, %arg1 : i32, i32, i32
  }
  func.func @transform_3(%arg0: i32, %arg1: i32) -> (i32, i32, i32) {
    %c0_i32 = arith.constant 0 : i32
    %c0_i32_0 = arith.constant 0 : i32
    %c0_i32_1 = arith.constant 0 : i32
    return %arg0, %c0_i32, %c0_i32_0 : i32, i32, i32
  }
}

</mosaic_0001>

<bundles_post_ra>
// kernel: chamfer_distance.1
= control target key start
LH: loop header
LB: loop body
LE: loop exit
PB: predicated region body
PF: predicated region fallthrough
CT: control target
= control target key end

     0   :  { %9 = vsyncpa [#allocation3], 0  ;;  %s1353_s0 = inlined_call_operand.vmem [shape: f32[2,128,3], index: 0, kind: input, shape index: {}]   ;;  %s1354_s1 = inlined_call_operand.vmem [shape: f32[2,3,128], index: 1, kind: input, shape index: {}]   ;;  %s1355_s2 = inlined_call_operand.hbm [shape: f32[2,1,128], index: 2, kind: output, shape index: {0}]   ;;  %s1356_s3 = inlined_call_operand.hbm [shape: f32[2,1,128], index: 3, kind: output, shape index: {1}]  }
   0x1   :  { %11 = vsyncpa [#allocation3 + $0x1], 0 }
   0x2   :  { %12 = vsyncpa [#allocation5], 0 }
   0x3   :  { %14 = vsyncpa [#allocation5 + $0x1], 0  ;;  %s1088_s12 = smov 0   ;;  %s1090_s13 = smov 0  }
   0x4   :  { %s1092_s14 = smov 0   ;;  %s1094_s15 = smov 0  }
   0x5   :  { %s1096_s16 = smov 0   ;;  %s1098_s17 = smov 0  }
   0x6 LB: > { %s863_s18 = sadd.s32 4294967295, %s1065_s17   ;;  %s864_s19 = sadd.s32 4294967294, %s1065_s17   ;;  %s1065_s17 = sphi %s1098_s17, %s20_s17   ;;  %s1061_s16 = sphi %s1096_s16, %s1363_s16   ;;  %s1057_s15 = sphi %s1094_s15, %s1362_s15   ;;  %s1053_s14 = sphi %s1092_s14, %s1361_s14   ;;  %s1049_s13 = sphi %s1090_s13, %s1360_s13   ;;  %s1045_s12 = sphi %s1088_s12, %s1359_s12  }
   0x7   : > { %s32_s20 = sadd.s32 1, %s1061_s16  ;;  %s95_s21 = sadd.s32 1, %s1053_s14 }
   0x8   : > { %p34_p0 = scmp.ge.s32.totalorder %s32_s20, 2  ;;  %p105_p1 = scmp.ne.s32.totalorder %s1053_s14, %s1049_s13 }
   0x9   : > { %p106_p2 = scmp.eq.s32.totalorder %s863_s18, 1  ;;  %p111_p3 = scmp.ne.s32.totalorder %s1049_s13, %s1045_s12 }
   0xa   : > { %s1365_s20 = smov (%p34_p0, %s32_s20), 0  ;;  %p112_p5 = scmp.eq.s32.totalorder %s864_s19, 1 }
   0xb   : > { %p1128_p4 = por %p106_p2, %p105_p1  ;;  %s90_s23 = ssub.s32 %s1061_s16, %s1365_s20 }
   0xc   : > { %p867_p6 = scmp.ge.s32.totalorder %s1065_s17, 1  ;;  %p93_p7 = scmp.eq.s32.totalorder %s90_s23, 0 }
   0xd   : > { %p1135_p8 = por %p112_p5, %p111_p3  ;;  %p176_p9 = scmp.lt.s32.totalorder %s1065_s17, 3 }
   0xe   : > { %s1141_s25 = scalar_select %p93_p7, %s1053_s14, %s95_s21  }
   0xf   : > { %p177_p10 = pnand %p867_p6, %p176_p9 }
  0x10   : > { %p212_p11 = scmp.lt.s32.totalorder (!%p177_p10), %s1057_s15, 1  ;;  %s1218_s8 = sand.u32 (!%p177_p10), 1, %s1049_s13  }
  0x11   : > { %180 = sbr.rel (%p177_p10) target bundleno = 332 (0x14c), region = 28  ;;  %s1235_s9 = scalar_lea.vmem (!%p177_p10), [#allocation4], %s1218_s8 }
  0x12   : > { %s749_s18 = scalar_lea.hbm (!%p177_p10), %s1356_s3, %s1057_s15  ;;  %s751_s19 = sshll.u32 (!%p177_p10), %s1235_s9, 4  ;;  %s752_s19 = int_to_ptr.vmem [resolvable:$true] %s751_s19 }
  0x13   : > { %s753_s21 = sshll.u32 (!%p177_p10), %s749_s18, 4  ;;  %s727_s23 = scalar_lea.sflag (!%p177_p10), [#allocation5], %s1218_s8  ;;  %s754_s21 = int_to_ptr.hbm [resolvable:$true] %s753_s21 }
  0x14   : > { %s975_s30 = scalar_lea.hbm (!%p177_p10), %s1356_s3, 2 }
  0x16   : > { %s213_s26 = scalar_select %p212_p11, %s1057_s15, 1  ;;  %vm313_vm0 = vcmask 1042432   ;;  %vm263_vm1 = vcmask 23552   ;;  %v501_v59 = vlaneseq }
  0x18   : > { %s890_s27 = sshll.u32 %s213_s26, 7  ;;  %s870_s28 = sshll.u32 %s213_s26, 2 }
  0x19   : > { %s1148_s4 = scalar_lea.vmem %s1353_s0, %s890_s27  ;;  %s224_s7 = scalar_lea.vmem %s1354_s1, %s870_s28 }
  0x1a   : > { %v246_v0 = vld [vmem:[%s224_s7] sm:$0x7]  ;;  %v235_v7 = vld [vmem:[%s1148_s4 + $0x28] sm:$0xff]  ;;  %v232_v8 = vld [vmem:[%s1148_s4 + $0x10] sm:$0xff]  ;;  %s969_s26 = sshra.s32 %s754_s21, 4  ;;  %s970_s26 = int_to_ptr.hbm [resolvable:$true] %s969_s26 }
  0x1b   : > { %v230_v1 = vld [vmem:[%s1148_s4] sm:$0xff]  ;;  %v312_v3 = vmul.f32 %v246_v0, %v246_v0  ;;  %871 = vmatpush.msk.msra.mxu0 %vm313_vm0, %v246_v0  ;;  %891 = vmatpush.msk.msra.mxu1 %vm313_vm0, %v246_v0  ;;  %v231_v9 = vld [vmem:[%s1148_s4 + $0x8] sm:$0xff]  ;;  %v249_v13 = vmul.f32 %v232_v8, %v232_v8  ;;  %v233_v15 = vld [vmem:[%s1148_s4 + $0x18] sm:$0xff]  ;;  %v252_v17 = vmul.f32 %v235_v7, %v235_v7  ;;  %s971_s27 = scalar_lea.hbm %s970_s26, 1  ;;  %p976_p1 = scmp.lt.s32.totalorder %s970_s26, %s1356_s3 }
  0x1c   : > { %v234_v2 = vld [vmem:[%s1148_s4 + $0x20] sm:$0xff]  ;;  %v247_v6 = vmul.f32 %v230_v1, %v230_v1  ;;  %892 = vmatpush.msk.msra.mxu2 %vm313_vm0, %v246_v0  ;;  %872 = vmatmul.msk.f32.vlgmr.msra.gmra.mxu0 %vm263_vm1, %v230_v1  ;;  %v248_v18 = vmul.f32 %v231_v9, %v231_v9  ;;  %v250_v19 = vmul.f32 %v233_v15, %v233_v15  ;;  %v239_v20 = vld [vmem:[%s1148_s4 + $0x48] sm:$0xff]  ;;  %v236_v23 = vld [vmem:[%s1148_s4 + $0x30] sm:$0xff]  ;;  %p972_p12 = scmp.ne.s32.totalorder %s970_s26, %s971_s27  ;;  %p977_p2 = scmp.lt.s32.totalorder %s975_s30, %s971_s27 }
  0x1d   : > { %v238_v4 = vld [vmem:[%s1148_s4 + $0x40] sm:$0xff]  ;;  %v251_v5 = vmul.f32 %v234_v2, %v234_v2  ;;  %v1164_v10 = vsel %vm313_vm0, %v312_v3, 0.0  ;;  %876 = vmatmul.msk.f32.vlgmr.msra.gmra.mxu1 %vm263_vm1, %v234_v2  ;;  %v270_v16 = vsel %vm263_vm1, %v249_v13, 0.0  ;;  %893 = vmatpush.msk.msra.mxu3 %vm313_vm0, %v246_v0  ;;  %v279_v21 = vsel %vm263_vm1, %v252_v17, 0.0  ;;  %v243_v25 = vld [vmem:[%s1148_s4 + $0x68] sm:$0xff]  ;;  %v237_v26 = vld [vmem:[%s1148_s4 + $0x38] sm:$0xff] }
  0x1e   : > { %880 = vmatmul.msk.f32.vlgmr.msra.gmra.mxu2 %vm263_vm1, %v238_v4  ;;  %v264_v12 = vsel %vm263_vm1, %v247_v6, 0.0  ;;  %v242_v14 = vld [vmem:[%s1148_s4 + $0x60] sm:$0xff]  ;;  %271 = vadd.xlane.f32.xlu1 %v270_v16  ;;  %v267_v22 = vsel %vm263_vm1, %v248_v18, 0.0  ;;  %v273_v24 = vsel %vm263_vm1, %v250_v19, 0.0  ;;  %v255_v27 = vmul.f32 %v238_v4, %v238_v4  ;;  %v240_v30 = vld [vmem:[%s1148_s4 + $0x50] sm:$0xff]  ;;  %v241_v35 = vld [vmem:[%s1148_s4 + $0x58] sm:$0xff]  ;;  %p973_p13 = pnand %p972_p12, %p1128_p4  ;;  %p978_p3 = por %p977_p2, %p976_p1 }
  0x1f   : > { %v276_v11 = vsel %vm263_vm1, %v251_v5, 0.0  ;;  %265 = vadd.xlane.f32.xlu0 %v264_v12  ;;  %884 = vmatmul.msk.f32.vlgmr.msra.gmra.mxu3 %vm263_vm1, %v242_v14  ;;  %v253_v28 = vmul.f32 %v236_v23, %v236_v23  ;;  %v254_v29 = vmul.f32 %v237_v26, %v237_v26  ;;  %v244_v34 = vld [vmem:[%s1148_s4 + $0x70] sm:$0xff]  ;;  %v256_v36 = vmul.f32 %v239_v20, %v239_v20  ;;  %v245_v42 = vld [vmem:[%s1148_s4 + $0x78] sm:$0xff] }
  0x20   : > { %277 = vadd.xlane.f32.xlu2 %v276_v11  ;;  %v288_v31 = vsel %vm263_vm1, %v255_v27, 0.0  ;;  %v258_v37 = vmul.f32 %v241_v35, %v241_v35  ;;  %v257_v38 = vmul.f32 %v240_v30, %v240_v30  ;;  %v259_v43 = vmul.f32 %v242_v14, %v242_v14  ;;  %p974_p0 = pneg %p973_p13 }
  0x21   : > { %v282_v32 = vsel %vm263_vm1, %v253_v28, 0.0  ;;  %v285_v33 = vsel %vm263_vm1, %v254_v29, 0.0  ;;  %v291_v39 = vsel %vm263_vm1, %v256_v36, 0.0  ;;  %v261_v44 = vmul.f32 %v244_v34, %v244_v34 }
  0x22   : > { %v297_v40 = vsel %vm263_vm1, %v258_v37, 0.0  ;;  %v294_v41 = vsel %vm263_vm1, %v257_v38, 0.0  ;;  %v260_v45 = vmul.f32 %v243_v25, %v243_v25  ;;  %v300_v46 = vsel %vm263_vm1, %v259_v43, 0.0  ;;  %p979_p5 = pnand %p978_p3, %p974_p0 }
  0x23   : > { %v306_v47 = vsel %vm263_vm1, %v261_v44, 0.0  ;;  %v262_v49 = vmul.f32 %v245_v42, %v245_v42  ;;  %v315_v51 = vrot.slane %v1164_v10, 4  ;;  %v1213_v0 = vand.u32 127, %v501_v59 }
  0x24   : > { %873 = vmatmul.msk.f32.gmra.mxu0 %vm263_vm1, %v231_v9  ;;  %v303_v48 = vsel %vm263_vm1, %v260_v45, 0.0 }
  0x25   : > { %877 = vmatmul.msk.f32.gmra.mxu1 %vm263_vm1, %v235_v7  ;;  %v309_v50 = vsel %vm263_vm1, %v262_v49, 0.0  ;;  %v316_v52 = vadd.f32 %v315_v51, %v1164_v10  ;;  %vm503_vm2 = vcmp.lt.s32.totalorder %v1213_v0, 80 }
  0x26   : > { %881 = vmatmul.msk.f32.gmra.mxu2 %vm263_vm1, %v239_v20  ;;  %274 = vadd.xlane.f32.xlu1 %v273_v24  ;;  %v1067_v24 = vmov inf  }
  0x27   : > { %268 = vadd.xlane.f32.xlu0 %v267_v22  ;;  %885 = vmatmul.msk.f32.gmra.mxu3 %vm263_vm1, %v243_v25  ;;  %v317_v53 = vrot.slane %v316_v52, 2  ;;  %229 = vst [vmem:[%s1235_s9] sm:$0x1] %v1067_v24 }
  0x28   : > { %280 = vadd.xlane.f32.xlu2 %v279_v21 }
  0x29   : > { %v318_v54 = vadd.f32 %v317_v53, %v316_v52 }
  0x2b   : > { %v319_v57 = vrot.slane %v318_v54, 1 }
  0x2c   : > { %874 = vmatmul.msk.f32.gmra.mxu0 %vm263_vm1, %v232_v8 }
  0x2d   : > { %878 = vmatmul.msk.f32.gmra.mxu1 %vm263_vm1, %v236_v23  ;;  %v1210_v60 = vadd.f32 %v319_v57, %v318_v54 }
  0x2e   : > { %882 = vmatmul.msk.f32.gmra.mxu2 %vm263_vm1, %v240_v30  ;;  %286 = vadd.xlane.f32.xlu1 %v285_v33 }
  0x2f   : > { %283 = vadd.xlane.f32.xlu0 %v282_v32  ;;  %886 = vmatmul.msk.f32.gmra.mxu3 %vm263_vm1, %v244_v34 }
  0x30   : > { %289 = vadd.xlane.f32.xlu2 %v288_v31 }
  0x34   : > { %875 = vmatmul.msk.f32.gmra.mxu0 %vm263_vm1, %v233_v15 }
  0x35   : > { %879 = vmatmul.msk.f32.gmra.mxu1 %vm263_vm1, %v237_v26 }
  0x36   : > { %883 = vmatmul.msk.f32.gmra.mxu2 %vm263_vm1, %v241_v35  ;;  %295 = vadd.xlane.f32.xlu1 %v294_v41 }
  0x37   : > { %292 = vadd.xlane.f32.xlu0 %v291_v39  ;;  %887 = vmatmul.msk.f32.gmra.mxu3 %vm263_vm1, %v245_v42 }
  0x38   : > { %298 = vadd.xlane.f32.xlu2 %v297_v40 }
  0x3e   : > { %304 = vadd.xlane.f32.xlu1 %v303_v48 }
  0x3f   : > { %301 = vadd.xlane.f32.xlu0 %v300_v46 }
  0x40   : > { %307 = vadd.xlane.f32.xlu2 %v306_v47 }
  0x47   : > { %310 = vadd.xlane.f32.xlu0 %v309_v50 }
  0x91   : > { %v272_v58 = vpop.xlane.xlu1 %271 }
  0x92   : > { %v266_v56 = vpop.xlane.xlu0 %265  ;;  %v439_v47 = vadd.f32 %v1210_v60, %v272_v58 }
  0x93   : > { %v278_v55 = vpop.xlane.xlu2 %277  ;;  %v437_v1 = vadd.f32 %v1210_v60, %v266_v56 }
  0x94   : > { %v441_v61 = vadd.f32 %v1210_v60, %v278_v55 }
  0x99   : > { %v389_v63 = vpop.f32.mrf.mxu0  ;;  %v275_v6 = vpop.xlane.xlu1 %274 }
  0x9a   : > { %v401_v2 = vpop.f32.mrf.mxu1  ;;  %v453_v3 = vmul.f32 2.0, %v389_v63  ;;  %v269_v4 = vpop.xlane.xlu0 %268  ;;  %v440_v59 = vadd.f32 %v1210_v60, %v275_v6 }
  0x9b   : > { %v281_v62 = vpop.xlane.xlu2 %280  ;;  %v457_v5 = vmul.f32 2.0, %v401_v2  ;;  %v438_v17 = vadd.f32 %v1210_v60, %v269_v4 }
  0x9c   : > { %v469_v7 = vsub.f32 %v437_v1, %v453_v3  ;;  %v442_v25 = vadd.f32 %v1210_v60, %v281_v62 }
  0x9d   : > { %v473_v8 = vsub.f32 %v441_v61, %v457_v5 }
  0x9e   : > { %v1220_v9 = vmax.f32 %v469_v7, 0.0 }
  0x9f   : > { %v1222_v10 = vmax.f32 %v473_v8, 0.0 }
  0xa0   : > { %v504_v12 = vsel %vm503_vm2, %v1220_v9, inf }
  0xa1   : > { %v413_v11 = vpop.f32.mrf.mxu2  ;;  %v508_v14 = vsel %vm503_vm2, %v1222_v10, inf  ;;  %v392_v16 = vpop.f32.mrf.mxu0  ;;  %587 = vmin.xlane.f32.xlu1 %v504_v12 }
  0xa2   : > { %v461_v13 = vmul.f32 2.0, %v413_v11  ;;  %v404_v18 = vpop.f32.mrf.mxu1  ;;  %595 = vmin.xlane.f32.xlu2 %v508_v14  ;;  %v454_v20 = vmul.f32 2.0, %v392_v16  ;;  %v284_v21 = vpop.xlane.xlu0 %283 }
  0xa3   : > { %v290_v15 = vpop.xlane.xlu2 %289  ;;  %v287_v22 = vpop.xlane.xlu1 %286  ;;  %v458_v26 = vmul.f32 2.0, %v404_v18  ;;  %v443_v48 = vadd.f32 %v1210_v60, %v284_v21 }
  0xa4   : > { %v445_v19 = vadd.f32 %v1210_v60, %v290_v15  ;;  %v1232_v23 = vpop.f32.mrf.mxu3  ;;  %v470_v28 = vsub.f32 %v438_v17, %v454_v20  ;;  %v444_v62 = vadd.f32 %v1210_v60, %v287_v22  ;;  %v699_v17 = vmin.f32 %v1220_v9, %v1222_v10 }
  0xa5   : > { %v474_v31 = vsub.f32 %v442_v25, %v458_v26 }
  0xa6   : > { %v477_v27 = vsub.f32 %v445_v19, %v461_v13  ;;  %v486_v30 = vmax.f32 %v470_v28, 0.0 }
  0xa7   : > { %v490_v42 = vmax.f32 %v474_v31, 0.0  ;;  %v465_v31 = vmul.f32 2.0, %v1232_v23 }
  0xa8   : > { %v493_v29 = vmax.f32 %v477_v27, 0.0  ;;  %v505_v34 = vsel %vm503_vm2, %v486_v30, inf }
  0xa9   : > { %v416_v32 = vpop.f32.mrf.mxu2  ;;  %v395_v36 = vpop.f32.mrf.mxu0  ;;  %v509_v53 = vsel %vm503_vm2, %v490_v42, inf  ;;  %v700_v11 = vmin.f32 %v486_v30, %v490_v42 }
  0xaa   : > { %v512_v33 = vsel %vm503_vm2, %v493_v29, inf  ;;  %v462_v35 = vmul.f32 2.0, %v416_v32  ;;  %v407_v37 = vpop.f32.mrf.mxu1  ;;  %589 = vmin.xlane.f32.xlu2 %v505_v34  ;;  %v293_v38 = vpop.xlane.xlu0 %292  ;;  %v455_v40 = vmul.f32 2.0, %v395_v36 }
  0xab   : > { %603 = vmin.xlane.f32.xlu0 %v512_v33  ;;  %v446_v39 = vadd.f32 %v1210_v60, %v293_v38  ;;  %v296_v41 = vpop.xlane.xlu1 %295  ;;  %v459_v44 = vmul.f32 2.0, %v407_v37  ;;  %v299_v46 = vpop.xlane.xlu2 %298  ;;  %v711_v26 = vmin.f32 %v699_v17, %v700_v11 }
  0xac   : > { %v428_v43 = vpop.f32.mrf.mxu3  ;;  %v447_v49 = vadd.f32 %v1210_v60, %v296_v41  ;;  %v471_v51 = vsub.f32 %v439_v47, %v455_v40  ;;  %v448_v15 = vadd.f32 %v1210_v60, %v299_v46 }
  0xad   : > { %v478_v45 = vsub.f32 %v446_v39, %v462_v35  ;;  %v475_v54 = vsub.f32 %v443_v48, %v459_v44  ;;  %v466_v29 = vmul.f32 2.0, %v428_v43 }
  0xae   : > { %v487_v3 = vmax.f32 %v471_v51, 0.0 }
  0xaf   : > { %v494_v50 = vmax.f32 %v478_v45, 0.0  ;;  %v491_v7 = vmax.f32 %v475_v54, 0.0 }
  0xb0   : > { %v506_v20 = vsel %vm503_vm2, %v487_v3, inf }
  0xb1   : > { %v419_v52 = vpop.f32.mrf.mxu2  ;;  %v398_v56 = vpop.f32.mrf.mxu0  ;;  %v513_v57 = vsel %vm503_vm2, %v494_v50, inf  ;;  %v510_v24 = vsel %vm503_vm2, %v491_v7, inf  ;;  %v701_v25 = vmin.f32 %v487_v3, %v491_v7 }
  0xb2   : > { %v463_v55 = vmul.f32 2.0, %v419_v52  ;;  %v456_v58 = vmul.f32 2.0, %v398_v56  ;;  %v410_v61 = vpop.f32.mrf.mxu1  ;;  %605 = vmin.xlane.f32.xlu1 %v513_v57  ;;  %v302_v14 = vpop.xlane.xlu0 %301 }
  0xb3   : > { %597 = vmin.xlane.f32.xlu0 %v509_v53  ;;  %v460_v1 = vmul.f32 2.0, %v410_v61  ;;  %v308_v16 = vpop.xlane.xlu2 %307  ;;  %v305_v19 = vpop.xlane.xlu1 %304  ;;  %v449_v32 = vadd.f32 %v1210_v60, %v302_v14 }
  0xb4   : > { %v479_v63 = vsub.f32 %v447_v49, %v463_v55  ;;  %v472_v2 = vsub.f32 %v440_v59, %v456_v58  ;;  %v431_v12 = vpop.f32.mrf.mxu3  ;;  %v451_v28 = vadd.f32 %v1210_v60, %v308_v16  ;;  %v450_v10 = vadd.f32 %v1210_v60, %v305_v19  ;;  %v698_v55 = vld [vmem:[%s1235_s9] sm:$0x1] }
  0xb5   : > { %v476_v4 = vsub.f32 %v444_v62, %v460_v1  ;;  %v467_v27 = vmul.f32 2.0, %v431_v12  ;;  %v481_v42 = vsub.f32 %v449_v32, %v465_v31 }
  0xb6   : > { %v495_v5 = vmax.f32 %v479_v63, 0.0  ;;  %v488_v8 = vmax.f32 %v472_v2, 0.0  ;;  %v482_v36 = vsub.f32 %v450_v10, %v466_v29 }
  0xb7   : > { %v492_v13 = vmax.f32 %v476_v4, 0.0  ;;  %v483_v35 = vsub.f32 %v451_v28, %v467_v27  ;;  %v497_v49 = vmax.f32 %v481_v42, 0.0 }
  0xb8   : > { %v514_v6 = vsel %vm503_vm2, %v495_v5, inf  ;;  %v507_v23 = vsel %vm503_vm2, %v488_v8, inf  ;;  %v498_v46 = vmax.f32 %v482_v36, 0.0 }
  0xb9   : > { %607 = vmin.xlane.f32.xlu2 %v514_v6  ;;  %v422_v18 = vpop.f32.mrf.mxu2  ;;  %v702_v21 = vmin.f32 %v488_v8, %v492_v13  ;;  %v511_v38 = vsel %vm503_vm2, %v492_v13, inf  ;;  %v499_v44 = vmax.f32 %v483_v35, 0.0 }
  0xba   : > { %v464_v22 = vmul.f32 2.0, %v422_v18  ;;  %599 = vmin.xlane.f32.xlu1 %v510_v24  ;;  %v311_v41 = vpop.xlane.xlu0 %310  ;;  %v517_v52 = vsel %vm503_vm2, %v498_v46, inf }
  0xbb   : > { %591 = vmin.xlane.f32.xlu0 %v506_v20  ;;  %v712_v30 = vmin.f32 %v701_v25, %v702_v21  ;;  %v452_v48 = vadd.f32 %v1210_v60, %v311_v41  ;;  %v518_v51 = vsel %vm503_vm2, %v499_v44, inf  ;;  %v516_v60 = vsel %vm503_vm2, %v497_v49, inf }
  0xbc   : > { %v480_v9 = vsub.f32 %v448_v15, %v464_v22  ;;  %v434_v40 = vpop.f32.mrf.mxu3 }
  0xbd   : > { %v713_v33 = vmin.f32 %v711_v26, %v712_v30  ;;  %v468_v47 = vmul.f32 2.0, %v434_v40 }
  0xbe   : > { %v496_v34 = vmax.f32 %v480_v9, 0.0 }
  0xbf   : > { %v714_v37 = vrot.slane %v713_v33, 4  ;;  %v484_v53 = vsub.f32 %v452_v48, %v468_v47 }
  0xc0   : > { %v515_v39 = vsel %vm503_vm2, %v496_v34, inf }
  0xc1   : > { %601 = vmin.xlane.f32.xlu2 %v511_v38  ;;  %v715_v43 = vmin.f32 %v713_v33, %v714_v37  ;;  %v500_v57 = vmax.f32 %v484_v53, 0.0 }
  0xc2   : > { %593 = vmin.xlane.f32.xlu1 %v507_v23 }
  0xc3   : > { %609 = vmin.xlane.f32.xlu0 %v515_v39  ;;  %v716_v45 = vrot.slane %v715_v43, 2 }
  0xc5   : > { %v717_v50 = vmin.f32 %v715_v43, %v716_v45 }
  0xc7   : > { %v718_v54 = vrot.slane %v717_v50, 1 }
  0xc9   : > { %613 = vmin.xlane.f32.xlu2 %v517_v52  ;;  %v719_v56 = vmin.f32 %v717_v50, %v718_v54 }
  0xca   : > { %611 = vmin.xlane.f32.xlu1 %v516_v60 }
  0xcb   : > { %615 = vmin.xlane.f32.xlu0 %v518_v51  ;;  %v720_v59 = vmin.f32 %v698_v55, %v719_v56 }
  0xcd   : > { %721 = vst [vmem:[%s1235_s9] sm:$0x1] %v720_v59 }
  0xce   : > { %982 = shalt.err (!%p979_p5)
}
  0xcf   : > { %895 = dma.vmem_to_hbm [thread:$0]  (%p1128_p4), %s752_s19, 16, %s754_s21, %s727_s23   ;;  %v519_v58 = vsel %vm503_vm2, %v500_v57, inf  ;;  %v636_v7 = vadd.s32 4294967288, %v1213_v0  ;;  %v640_v11 = vadd.s32 4294967280, %v1213_v0  ;;  %v644_v13 = vadd.s32 4294967272, %v1213_v0 }
  0xd0   : > { %v648_v14 = vadd.s32 4294967264, %v1213_v0  ;;  %vm638_vm3 = vcmask 130112   ;;  %v652_v16 = vadd.s32 4294967256, %v1213_v0  ;;  %vm642_vm4 = vcmask 195712   ;;  %s736_s9 = scalar_lea.hbm %s1355_s2, %s1057_s15  ;;  %s204_s10 = scalar_lea.vmem [#allocation2], %s1218_s8 }
  0xd1   : > { %v664_v17 = vadd.s32 4294967232, %v1213_v0  ;;  %v656_v18 = vadd.s32 4294967248, %v1213_v0  ;;  %vm646_vm5 = vcmask 261312   ;;  %v660_v22 = vadd.s32 4294967240, %v1213_v0  ;;  %s738_s11 = sshll.u32 %s204_s10, 4  ;;  %s740_s18 = sshll.u32 %s736_s9, 4  ;;  %s739_s11 = int_to_ptr.vmem [resolvable:$true] %s738_s11  ;;  %s741_s18 = int_to_ptr.hbm [resolvable:$true] %s740_s18 }
  0xd2   : > { %617 = vmin.xlane.f32.xlu1 %v519_v58  ;;  %vm650_vm6 = vcmask 326912   ;;  %v668_v26 = vadd.s32 4294967224, %v1213_v0  ;;  %vm654_vm7 = vcmask 392512   ;;  %vm658_vm8 = vcmask 458112   ;;  %s723_s15 = scalar_lea.sflag [#allocation3], %s1218_s8  ;;  %s997_s19 = sshra.s32 %s741_s18, 4  ;;  %s998_s19 = int_to_ptr.hbm [resolvable:$true] %s997_s19 }
  0xd3   : > { %v676_v9 = vadd.s32 4294967208, %v1213_v0  ;;  %v672_v30 = vadd.s32 4294967216, %v1213_v0  ;;  %vm662_vm9 = vcmask 523712   ;;  %vm666_vm10 = vcmask 589312   ;;  %s999_s21 = scalar_lea.hbm %s998_s19, 1  ;;  %s1003_s27 = scalar_lea.hbm %s1355_s2, 2 }
  0xd4   : > { %v680_v35 = vadd.s32 4294967200, %v1213_v0  ;;  %vm670_vm11 = vcmask 654912   ;;  %vm674_vm12 = vcmask 720512   ;;  %vm678_vm13 = vcmask 786112   ;;  %p1000_p6 = scmp.ne.s32.totalorder %s998_s19, %s999_s21  ;;  %p1004_p10 = scmp.lt.s32.totalorder %s998_s19, %s1355_s2 }
  0xd5   : > { %v684_v44 = vadd.s32 4294967192, %v1213_v0  ;;  %vm682_vm14 = vcmask 851712   ;;  %vm686_vm15 = vcmask 917312   ;;  %v688_v50 = vadd.s32 4294967184, %v1213_v0  ;;  %p1005_p11 = scmp.lt.s32.totalorder %s1003_s27, %s999_s21 }
  0xd6   : > { %v692_v53 = vadd.s32 4294967176, %v1213_v0  ;;  %vm690_vm0 = vcmask 982912   ;;  %vm694_vm1 = vcmask 1048512   ;;  %p1001_p7 = pnand %p1000_p6, %p1128_p4 }
  0xd7   : > { %p1006_p12 = por %p1005_p11, %p1004_p10 }
  0xd8   : > { %p1002_p9 = pneg %p1001_p7 }
  0xda   : > { %p1007_p13 = pnand %p1006_p12, %p1002_p9 }
 0x114   : > { %v588_v63 = vpop.xlane.xlu1 %587 }
 0x115   : > { %v596_v61 = vpop.xlane.xlu2 %595  ;;  %v635_v15 = vperm.slane %v588_v63, %v1213_v0 }
 0x116   : > { %v649_v25 = vperm.slane %v596_v61, %v648_v14 }
 0x11d   : > { %v590_v1 = vpop.xlane.xlu2 %589 }
 0x11e   : > { %v604_v62 = vpop.xlane.xlu0 %603  ;;  %v637_v12 = vperm.slane %v590_v1, %v636_v7 }
 0x11f   : > { %v665_v36 = vperm.slane %v604_v62, %v664_v17 }
 0x120   : > { %v639_v21 = vsel %vm638_vm3, %v637_v12, %v635_v15 }
 0x125   : > { %v606_v3 = vpop.xlane.xlu1 %605 }
 0x126   : > { %v598_v2 = vpop.xlane.xlu0 %597  ;;  %v669_v38 = vperm.slane %v606_v3, %v668_v26 }
 0x127   : > { %v653_v28 = vperm.slane %v598_v2, %v652_v16 }
 0x12c   : > { %v608_v4 = vpop.xlane.xlu2 %607 }
 0x12d   : > { %v600_v5 = vpop.xlane.xlu1 %599  ;;  %v673_v41 = vperm.slane %v608_v4, %v672_v30 }
 0x12e   : > { %v592_v8 = vpop.xlane.xlu0 %591  ;;  %v657_v31 = vperm.slane %v600_v5, %v656_v18 }
 0x12f   : > { %v641_v6 = vperm.slane %v592_v8, %v640_v11 }
 0x131   : > { %v643_v27 = vsel %vm642_vm4, %v641_v6, %v639_v21 }
 0x134   : > { %v602_v19 = vpop.xlane.xlu2 %601 }
 0x135   : > { %v594_v20 = vpop.xlane.xlu1 %593  ;;  %v661_v33 = vperm.slane %v602_v19, %v660_v22 }
 0x136   : > { %v645_v24 = vperm.slane %v594_v20, %v644_v13  ;;  %v610_v10 = vpop.xlane.xlu0 %609 }
 0x137   : > { %v677_v40 = vperm.slane %v610_v10, %v676_v9 }
 0x138   : > { %v647_v29 = vsel %vm646_vm5, %v645_v24, %v643_v27 }
 0x139   : > { %v651_v32 = vsel %vm650_vm6, %v649_v25, %v647_v29 }
 0x13a   : > { %v655_v34 = vsel %vm654_vm7, %v653_v28, %v651_v32 }
 0x13b   : > { %v659_v37 = vsel %vm658_vm8, %v657_v31, %v655_v34 }
 0x13c   : > { %v663_v39 = vsel %vm662_vm9, %v661_v33, %v659_v37  ;;  %v614_v47 = vpop.xlane.xlu2 %613 }
 0x13d   : > { %v667_v42 = vsel %vm666_vm10, %v665_v36, %v663_v39  ;;  %v612_v43 = vpop.xlane.xlu1 %611  ;;  %v685_v51 = vperm.slane %v614_v47, %v684_v44 }
 0x13e   : > { %v671_v23 = vsel %vm670_vm11, %v669_v38, %v667_v42  ;;  %v681_v45 = vperm.slane %v612_v43, %v680_v35  ;;  %v616_v52 = vpop.xlane.xlu0 %615 }
 0x13f   : > { %v675_v46 = vsel %vm674_vm12, %v673_v41, %v671_v23  ;;  %v689_v55 = vperm.slane %v616_v52, %v688_v50 }
 0x140   : > { %v679_v48 = vsel %vm678_vm13, %v677_v40, %v675_v46 }
 0x141   : > { %v683_v49 = vsel %vm682_vm14, %v681_v45, %v679_v48 }
 0x142   : > { %v687_v54 = vsel %vm686_vm15, %v685_v51, %v683_v49 }
 0x143   : > { %v691_v57 = vsel %vm690_vm0, %v689_v55, %v687_v54 }
 0x145   : > { %v618_v60 = vpop.xlane.xlu1 %617 }
 0x146   : > { %v693_v56 = vperm.slane %v618_v60, %v692_v53 }
 0x148   : > { %v695_v59 = vsel %vm694_vm1, %v693_v56, %v691_v57 }
 0x149   : > { %697 = vst [vmem:[%s204_s10] sm:$0x1] %v695_v59 }
 0x14a   : > { %1010 = shalt.err (!%p1007_p13)
}
 0x14b   : > { %894 = dma.vmem_to_hbm [thread:$0]  (%p1128_p4), %s739_s11, 16, %s741_s18, %s723_s15  }
 0x14c PF: > { %p905_p0 = scmp.ge.s32.totalorder %s1065_s17, 2  ;;  %s765_s8 = sand.u32 1, %s1045_s12  }
 0x14d   : > { %s766_s30 = scalar_lea.sflag [#allocation3], %s765_s8 }
 0x14e   : > { %p899_p1 = pnand %p905_p0, %p1135_p8 }
 0x150   : > { %p900_p2 = pneg %p899_p1 }
 0x152   : > { %1036 = dma.done.wait (%p900_p2), %s766_s30, 16  }
 0x153   : > { %1038 = vsyncadd (%p900_p2), %s766_s30, 4294967280  ;;  %s775_s4 = scalar_lea.sflag [#allocation5], %s765_s8 }
 0x154   : > { %1040 = dma.done.wait (%p900_p2), %s775_s4, 16  }
 0x155   : > { %1042 = vsyncadd (%p900_p2), %s775_s4, 4294967280  ;;  %s20_s17 = sadd.s32 1, %s1065_s17   ;;  %s1359_s12 = smov %s1049_s13 }
 0x156   : > { %p17_p3 = scmp.ge.s32.totalorder %s20_s17, 4   ;;  %s1360_s13 = smov %s1053_s14 }
 0x157   : > { %s1361_s14 = smov %s1141_s25  ;;  %s1362_s15 = smov %s1061_s16 }
 0x158   : > { %s1363_s16 = smov %s1365_s20  ;;  %19 = sbr.rel (!%p17_p3) target bundleno = 6 (0x6), region = 87 }
 0x15d   :  { %780 = vsyncpa [#allocation3], 1 }
 0x15e   :  { %782 = vsyncpa [#allocation3 + $0x1], 1 }
 0x15f   :  { %783 = vsyncpa [#allocation5], 1 }
 0x160   :  { %785 = vsyncpa [#allocation5 + $0x1], 1 }

</bundles_post_ra>
